<compile_context>
chip_gen: v7x
topology: tpu7x:2x2x1
jax: 0.10.0
libtpu: 0.0.40
codegen_flags: <defaults>
</compile_context>

<pallas_src>
import functools

import numpy as np
import jax
import jax.numpy as jnp
from jax import lax
from jax.experimental import pallas as pl
from jax.experimental.pallas import tpu as pltpu


_LANE = 128
_BLOCK_TARGET_BYTES = 2 << 20          # ~2 MiB per array per block (v5e-safe, double-buffered)
_GOLDEN = 0x9E3779B1


# -----------------------------------------------------------------------------
# Parameter / buffer setup (mirrors PyTorch __init__)
# -----------------------------------------------------------------------------
def make_positional_encoding(max_len: int, d_model: int) -> jnp.ndarray:
    """Returns pe of shape (1, max_len, d_model), same math as the torch module."""
    position = jnp.arange(0, max_len, dtype=jnp.float32)[:, None]             # (L, 1)
    div_term = jnp.exp(
        jnp.arange(0, d_model, 2, dtype=jnp.float32) * -(np.log(10000.0) / d_model)
    )                                                                           # (D/2,)
    pe = jnp.zeros((max_len, d_model), dtype=jnp.float32)
    pe = pe.at[:, 0::2].set(jnp.sin(position * div_term))
    pe = pe.at[:, 1::2].set(jnp.cos(position * div_term))
    return pe[None, :, :]                                                       # (1, L, D)


# -----------------------------------------------------------------------------
# Layout: lane-dense (rows, 128) view of the flattened S*D row, always padded
# so rows is a multiple of a sublane-aligned tile size.
# -----------------------------------------------------------------------------
def _choose_layout(n_elems: int, dtype):
    itemsize = jnp.dtype(dtype).itemsize
    sub = {4: 8, 2: 16, 1: 32}.get(itemsize, 8)        # native sublane packing
    lane = _LANE
    rows_raw = -(-n_elems // lane)                      # ceil(N / 128)
    rows_min = -(-rows_raw // sub) * sub                # round up to packing granule
    target_rows = max(sub, (_BLOCK_TARGET_BYTES // (lane * itemsize) // sub) * sub)
    tile_rows = min(target_rows, rows_min)
    rows = -(-rows_raw // tile_rows) * tile_rows        # pad rows to tile multiple
    return rows, lane, tile_rows


def prepare_pe(pe: jnp.ndarray, seq_len: int, dtype):
    """Slice / cast / pad / reshape pe once at init (hoisted out of the hot path).

    Returns (pe_rows, layout) where pe_rows is (1, rows, 128) in `dtype` and
    layout = (rows, lane, tile_rows).
    """
    d_model = pe.shape[-1]
    n = seq_len * d_model
    rows, lane, tile_rows = _choose_layout(n, dtype)
    flat = pe[:, :seq_len, :].astype(dtype).reshape(1, n)
    pad = rows * lane - n
    if pad:
        flat = jnp.pad(flat, ((0, 0), (0, pad)))
    return flat.reshape(1, rows, lane), (rows, lane, tile_rows)


# -----------------------------------------------------------------------------
# Pallas kernel: y = dropout(x + pe)   (inverted dropout, training semantics)
# -----------------------------------------------------------------------------
def _mix32(h):
    # lowbias32 finalizer — cheap VPU-only avalanche hash on uint32.
    h = h ^ (h >> 16)
    h = h * jnp.uint32(0x7FEB352D)
    h = h ^ (h >> 15)
    h = h * jnp.uint32(0x846CA68B)
    h = h ^ (h >> 16)
    return h


def _mix32_cheap(h):
    # Shorter mix for sub-32-bit dtypes: keeps the VALU slot from overtaking DMA.
    # TODO(synk): pack 2 bf16 keep-decisions per hashed u32 (16-bit fields) for a
    # further 2x cut in hash work.
    h = h * jnp.uint32(_GOLDEN)
    h = h ^ (h >> 15)
    h = h * jnp.uint32(0x85EBCA6B)
    h = h ^ (h >> 13)
    return h


def _pe_dropout_kernel(seed_ref, x_ref, pe_ref, o_ref, *,
                       keep_thresh: int, inv_keep: float,
                       tile_rows: int, lane: int, n_batch: int,
                       apply_dropout: bool, cheap_hash: bool, compute_dtype):
    # x_ref / pe_ref / o_ref are (tile_rows, lane) lane-dense blocks
    # (batch dim squeezed by the BlockSpec).
    y = x_ref[...].astype(compute_dtype) + pe_ref[...].astype(compute_dtype)

    if apply_dropout:  # static (compile-time) branch
        t = pl.program_id(0).astype(jnp.uint32)     # row-tile (outer)
        b = pl.program_id(1).astype(jnp.uint32)     # batch (inner)
        # All index math in uint32: per-tile mixed seed, within-tile gid only,
        # so there is no signed overflow and masks stay unique for huge calls.
        tile_id = t * jnp.uint32(n_batch) + b
        seed = seed_ref[0].astype(jnp.uint32)
        tile_seed = _mix32(seed ^ (tile_id * jnp.uint32(_GOLDEN)))

        row_i = lax.broadcasted_iota(jnp.int32, (tile_rows, lane), 0).astype(jnp.uint32)
        col_i = lax.broadcasted_iota(jnp.int32, (tile_rows, lane), 1).astype(jnp.uint32)
        gid = row_i * jnp.uint32(lane) + col_i

        mix = _mix32_cheap if cheap_hash else _mix32
        bits = mix(gid ^ tile_seed)
        keep = bits >= jnp.uint32(keep_thresh)          # P(drop) = thresh / 2^32
        scale = jnp.asarray(inv_keep, dtype=compute_dtype)
        zero = jnp.asarray(0.0, dtype=compute_dtype)
        y = jnp.where(keep, y * scale, zero)

    o_ref[...] = y.astype(o_ref.dtype)


# -----------------------------------------------------------------------------
# Wrapper
# -----------------------------------------------------------------------------
def positional_encoding_forward(x, pe=None, *, dropout_p: float, seed: int = 0,
                                pe_prepared=None):
    """x: (B, S, D). pe: (1, max_len, D) float32 buffer (as in the torch module).

    Pass pe_prepared=prepare_pe(pe, S, x.dtype) to hoist the pe slice/cast/pad
    out of the per-call hot path.  Returns (B, S, D) in x.dtype.
    """
    B, S, D = x.shape
    n = S * D
    p = float(dropout_p)
    if p >= 1.0:            # torch Dropout(p=1) zeroes everything; avoid inf scale
        return jnp.zeros_like(x)
    p = max(p, 0.0)

    if pe_prepared is None:
        if pe is None:
            raise ValueError("pass either pe or pe_prepared")
        pe_prepared = prepare_pe(pe, S, x.dtype)
    pe_rows, (rows, lane, tile_rows) = pe_prepared
    n_row_tiles = rows // tile_rows

    xf = x.reshape(B, n)
    pad = rows * lane - n
    if pad:
        xf = jnp.pad(xf, ((0, 0), (0, pad)))
    xr = xf.reshape(B, rows, lane)

    seed_arr = jnp.array([seed], dtype=jnp.int32)
    keep_thresh = min(int(round(p * float(1 << 32))), (1 << 32) - 1)
    inv_keep = 1.0 / (1.0 - p) if p > 0.0 else 1.0

    itemsize = jnp.dtype(x.dtype).itemsize
    # Native 16-bit math on v6e/v7x (halves VALU work + vreg pressure).
    # TODO(synk): force f32 compute on v5e (no bf16 VALU) via a chip query.
    compute_dtype = x.dtype if itemsize == 2 else jnp.float32

    kernel = functools.partial(
        _pe_dropout_kernel,
        keep_thresh=keep_thresh, inv_keep=inv_keep,
        tile_rows=tile_rows, lane=lane, n_batch=B,
        apply_dropout=(p > 0.0), cheap_hash=(itemsize < 4),
        compute_dtype=compute_dtype,
    )

    grid_spec = pltpu.PrefetchScalarGridSpec(
        num_scalar_prefetch=1,                        # seed lands in SMEM
        # Row-tile OUTER, batch INNER: pe's block index (0, t, 0) is unchanged
        # across consecutive (inner) batch steps, so Pallas skips re-DMA'ing
        # the broadcast pe tile — pe HBM reads ~S*D instead of B*S*D.
        grid=(n_row_tiles, B),
        in_specs=[
            pl.BlockSpec((None, tile_rows, lane), lambda t, b, seed: (b, t, 0)),  # x
            pl.BlockSpec((None, tile_rows, lane), lambda t, b, seed: (0, t, 0)),  # pe (batch-bcast)
        ],
        out_specs=pl.BlockSpec((None, tile_rows, lane), lambda t, b, seed: (b, t, 0)),
    )

    out = pl.pallas_call(
        kernel,
        out_shape=jax.ShapeDtypeStruct((B, rows, lane), x.dtype),
        grid_spec=grid_spec,
        compiler_params=pltpu.CompilerParams(
            # Stateless hash PRNG -> every block is independent; megacore (v7x)
            # shards the outer row-tile axis, each core still reuses pe over B.
            dimension_semantics=("parallel", "parallel"),
            vmem_limit_bytes=32 * 1024 * 1024,
        ),
    )(seed_arr, xr, pe_rows)

    out = out.reshape(B, rows * lane)
    if pad:
        out = out[:, :n]
    return out.reshape(B, S, D)


# -----------------------------------------------------------------------------
# Demo / self-check
# -----------------------------------------------------------------------------
if __name__ == "__main__":
    key = jax.random.PRNGKey(0)

    B, S, D = 2, 8, 32          # batch=2, seq=8, d_model=32
    MAX_LEN = 5000              # same default as the PyTorch module
    DROPOUT_P = 0.1

    x = jax.random.normal(key, (B, S, D), dtype=jnp.float32)
    pe = make_positional_encoding(MAX_LEN, D)
    ref = x + pe[:, :S, :]

    # pe prepared once (slice/cast/pad/reshape hoisted out of the hot path).
    pe_prep = prepare_pe(pe, S, x.dtype)

    # 1) dropout disabled (eval-equivalent) — must match x + pe.
    y_nodrop = positional_encoding_forward(x, dropout_p=0.0, seed=0, pe_prepared=pe_prep)
    y_nodrop = jax.block_until_ready(y_nodrop)
    assert y_nodrop.shape == (B, S, D)
    assert jnp.allclose(y_nodrop, ref, atol=1e-6), "no-dropout path mismatch"

    # 2) dropout enabled (training semantics, deterministic per seed).
    y_drop = positional_encoding_forward(x, dropout_p=DROPOUT_P, seed=1234, pe_prepared=pe_prep)
    y_drop = jax.block_until_ready(y_drop)
    assert y_drop.shape == (B, S, D) and y_drop.dtype == jnp.float32

    # Every element is either exactly zero (dropped) or (x+pe)/(1-p) (kept).
    ref_scaled = ref * jnp.float32(1.0 / (1.0 - DROPOUT_P))
    ok = jnp.logical_or(y_drop == 0.0,
                        jnp.isclose(y_drop, ref_scaled, rtol=1e-5, atol=1e-6))
    assert bool(jnp.all(ok)), "dropout path produced unexpected values"
    n_zero = int(jnp.sum(y_drop == 0.0))
    assert 0 < n_zero < y_drop.size, "dropout mask degenerate"

    print("KERNEL_OK")
</pallas_src>

<mosaic_0001>
module attributes {stable_mosaic.version = 11 : i64} {
  func.func @_pe_dropout_kernel(%arg0: i32, %arg1: i32, %arg2: memref<1xi32, #tpu.memory_space<smem>>, %arg3: memref<1x8x128xf32, #tpu.memory_space<vmem>>, %arg4: memref<1x8x128xf32, #tpu.memory_space<vmem>>, %arg5: memref<1x8x128xf32, #tpu.memory_space<vmem>>) attributes {dimension_semantics = [#tpu.dimension_semantics<parallel>, #tpu.dimension_semantics<parallel>], iteration_bounds = array<i64: 1, 2>, scalar_prefetch = 1 : i64, scratch_operands = 0 : i64, tpu.core_type = #tpu.core_type<tc>, window_params = [{transform_indices = @transform_0, window_bounds = array<i64: 1, 8, 128>}, {transform_indices = @transform_1, window_bounds = array<i64: 1, 8, 128>}, {transform_indices = @transform_2, window_bounds = array<i64: 1, 8, 128>}]} {
    %c0 = arith.constant 0 : index
    %c0_0 = arith.constant 0 : index
    %c0_1 = arith.constant 0 : index
    %0 = vector.load %arg3[%c0, %c0_0, %c0_1] : memref<1x8x128xf32, #tpu.memory_space<vmem>>, vector<1x8x128xf32>
    %1 = vector.shape_cast %0 : vector<1x8x128xf32> to vector<8x128xf32>
    %c0_2 = arith.constant 0 : index
    %c0_3 = arith.constant 0 : index
    %c0_4 = arith.constant 0 : index
    %2 = vector.load %arg4[%c0_2, %c0_3, %c0_4] : memref<1x8x128xf32, #tpu.memory_space<vmem>>, vector<1x8x128xf32>
    %3 = vector.shape_cast %2 : vector<1x8x128xf32> to vector<8x128xf32>
    %4 = arith.addf %1, %3 : vector<8x128xf32>
    %c0_5 = arith.constant 0 : index
    %c0_6 = arith.constant 0 : index
    %c0_7 = arith.constant 0 : index
    %5 = vector.load %arg5[%c0_5, %c0_6, %c0_7] : memref<1x8x128xf32, #tpu.memory_space<vmem>>, vector<1x8x128xf32>
    %6 = vector.shape_cast %5 : vector<1x8x128xf32> to vector<8x128xf32>
    %7 = vector.shape_cast %4 : vector<8x128xf32> to vector<1x8x128xf32>
    tpu.vector_store %arg5[%c0_5, %c0_6, %c0_7], %7 {strides = array<i32>} : memref<1x8x128xf32, #tpu.memory_space<vmem>>, vector<1x8x128xf32>,
    return
  }
  func.func @transform_0(%arg0: i32, %arg1: i32, %arg2: memref<1xi32, #tpu.memory_space<smem>>) -> (i32, i32, i32) {
    %c0_i32 = arith.constant 0 : i32
    %c0_i32_0 = arith.constant 0 : i32
    return %arg1, %arg0, %c0_i32 : i32, i32, i32
  }
  func.func @transform_1(%arg0: i32, %arg1: i32, %arg2: memref<1xi32, #tpu.memory_space<smem>>) -> (i32, i32, i32) {
    %c0_i32 = arith.constant 0 : i32
    %c0_i32_0 = arith.constant 0 : i32
    %c0_i32_1 = arith.constant 0 : i32
    return %c0_i32, %arg0, %c0_i32_0 : i32, i32, i32
  }
  func.func @transform_2(%arg0: i32, %arg1: i32, %arg2: memref<1xi32, #tpu.memory_space<smem>>) -> (i32, i32, i32) {
    %c0_i32 = arith.constant 0 : i32
    %c0_i32_0 = arith.constant 0 : i32
    return %arg1, %arg0, %c0_i32 : i32, i32, i32
  }
}

</mosaic_0001>

<bundles_post_ra>
// kernel: tpu_custom_call.1
= control target key start
LH: loop header
LB: loop body
LE: loop exit
PB: predicated region body
PF: predicated region fallthrough
CT: control target
= control target key end

     0   :  { %9 = vsyncpa [#allocation5], 0  ;;  %s782_s0 = inlined_call_operand.<no memory space> [shape: s32[1], index: 0, kind: input, shape index: {}]   ;;  %s783_s1 = inlined_call_operand.hbm [shape: f32[2,8,128], index: 1, kind: input, shape index: {}]   ;;  %s784_s2 = inlined_call_operand.hbm [shape: f32[1,8,128], index: 2, kind: input, shape index: {}]   ;;  %s785_s3 = inlined_call_operand.hbm [shape: f32[2,8,128], index: 3, kind: output, shape index: {}]  }
   0x1   :  { %11 = vsyncpa [#allocation5 + $0x1], 0 }
   0x2   :  { %12 = vsyncpa [#allocation8], 0 }
   0x3   :  { %13 = vsyncpa [#allocation6], 0 }
   0x4   :  { %15 = vsyncpa [#allocation6 + $0x1], 0  ;;  %s566_s12 = smov 0   ;;  %s568_s13 = smov 0  }
   0x5   :  { %s570_s14 = smov 0   ;;  %s572_s0 = smov 0  }
   0x6   :  { %s574_s15 = smov 0   ;;  %s576_s16 = smov 0  }
   0x7 LB: > { %s309_s17 = sadd.s32 4294967295, %s541_s16   ;;  %s310_s18 = sadd.s32 4294967294, %s541_s16   ;;  %s541_s16 = sphi %s576_s16, %s21_s16   ;;  %s537_s15 = sphi %s574_s15, %s810_s15   ;;  %s533_s0 = sphi %s572_s0, %s809_s0   ;;  %s529_s14 = sphi %s570_s14, %s808_s14   ;;  %s525_s13 = sphi %s568_s13, %s807_s13   ;;  %s521_s12 = sphi %s566_s12, %s806_s12  }
   0x8   : > { %p55_p0 = scmp.ne.s32.totalorder %s525_s13, %s521_s12  ;;  %p600_p1 = scmp.eq.s32.totalorder %s309_s17, 0 }
   0x9   : > { %p604_p2 = scmp.eq.s32.totalorder %s309_s17, 1  ;;  %p113_p3 = scmp.eq.s32.totalorder %s310_s18, 1 }
   0xa   : > { %s790_s19 = scalar_select %p600_p1, 1, 0 }
   0xb   : > { %s791_s20 = scalar_select %p604_p2, 1, 0 }
   0xc   : > { %p610_p4 = por %p600_p1, %p55_p0  ;;  %p311_p5 = scmp.ge.s32.totalorder %s541_s16, 1 }
   0xd   : > { %p615_p6 = por %p113_p3, %p55_p0  ;;  %p120_p7 = scmp.lt.s32.totalorder %s541_s16, 3 }
   0xe   : > { %s792_s21 = scalar_select %p610_p4, 1, 0 }
   0xf   : > { %s793_s22 = scalar_select %p615_p6, 1, 0 }
  0x10   : > { %p620_p8 = pnand %p311_p5, %p120_p7  ;;  %s543_s24 = smov [#allocation7]  }
  0x11   : > { %s135_s25 = sshll.u32 %s543_s24, 4  ;;  %s30_s27 = sadd.s32 1, %s537_s15  ;;  %s136_s25 = int_to_ptr.vmem [resolvable:$true] %s135_s25 }
  0x12   : > { %s794_s23 = scalar_select %p620_p8, 1, 0 }
  0x13   : > { %p332_p10 = pneg %p620_p8  ;;  %s42_s28 = sadd.s32 1, %s529_s14 }
  0x14   : > { %p635_p12 = scmp.ge.s32.totalorder %s30_s27, 2  ;;  %s397_s5 = scalar_lea.hbm %s784_s2, 128 }
  0x15   : > { %p629_p11 = pnand %p332_p10, %p600_p1  ;;  %p398_p13 = scmp.ne.s32.totalorder %s784_s2, %s397_s5 }
  0x16   : > { %s796_s29 = scalar_select %p635_p12, 1, 0 }
  0x17   : > { %p399_p0 = pneg %p629_p11  ;;  %p404_p7 = scmp.lt.u32.totalorder %s397_s5, %s784_s2 }
  0x19   : > { %p400_p3 = pnand %p399_p0, %p398_p13 }
  0x1b   : > { %p401_p5 = pneg %p400_p3 }
  0x1d   : > { %p406_p10 = pnand %p404_p7, %p401_p5 }
  0x1f   : > { %409 = shalt.err (!%p406_p10)
}
  0x20   : > { %s410_s10 = scalar_lea.vmem %s136_s25, 128  ;;  %p418_p4 = scmp.lt.s32.totalorder %s136_s25, %s136_s25 }
  0x21   : > { %p411_p9 = scmp.ne.s32.totalorder %s136_s25, %s410_s10  ;;  %p419_p8 = scmp.lt.s32.totalorder %s410_s10, %s410_s10 }
  0x23   : > { %p413_p6 = pnand %p411_p9, %p399_p0  ;;  %p420_p2 = por %p419_p8, %p418_p4 }
  0x25   : > { %p414_p1 = pneg %p413_p6 }
  0x27   : > { %p421_p12 = pnand %p420_p2, %p414_p1 }
  0x29   : > { %424 = shalt.err (!%p421_p12)
}
  0x2a   : > { %335 = dma.hbm_to_vmem [thread:$0]  (!%p629_p11), %s784_s2, 128, %s136_s25, [#allocation8]  }
  0x2b   : > { %p797_p4 = scmp.ne.s32.totalorder %s796_s29, 0  ;;  %p49_p1 = scmp.ne.s32.totalorder %s529_s14, %s525_s13 }
  0x2c   : > { %p50_p2 = scmp.eq.s32.totalorder %s541_s16, 0  ;;  %p345_p6 = scmp.lt.s32.totalorder %s541_s16, 2 }
  0x2d   : > { %s812_s27 = smov (%p797_p4, %s30_s27), 0  ;;  %p798_p12 = scmp.ne.s32.totalorder %s791_s20, 0 }
  0x2e   : > { %s37_s18 = ssub.s32 %s537_s15, %s812_s27  ;;  %p51_p9 = por %p50_p2, %p49_p1 }
  0x2f   : > { %p40_p8 = scmp.eq.s32.totalorder %s37_s18, 0  ;;  %p667_p13 = por %p798_p12, %p49_p1 }
  0x30   : > { %s146_s26 = sand.u32 1, %s529_s14   ;;  %s315_s29 = sshll.u32 %s537_s15, 7 }
  0x31   : > { %s675_s30 = scalar_select %p40_p8, %s529_s14, %s42_s28  }
  0x32   : > { %s314_s25 = sshll.u32 %s146_s26, 3  ;;  %s681_s6 = scalar_lea.hbm %s783_s1, %s315_s29 }
  0x33   : > { %s150_s20 = scalar_lea.vmem [#allocation4], %s314_s25  ;;  %p685_p11 = pnand %p345_p6, %p51_p9 }
  0x34   : > { %s158_s7 = sshll.u32 %s150_s20, 4  ;;  %s147_s28 = scalar_lea.sflag [#allocation5], %s146_s26  ;;  %s683_s7 = int_to_ptr.vmem [resolvable:$true] %s158_s7 }
  0x35   : > { %s425_s9 = scalar_lea.hbm %s681_s6, 128  ;;  %p427_p3 = pneg %p685_p11 }
  0x36   : > { %p426_p0 = scmp.ne.s32.totalorder %s681_s6, %s425_s9  ;;  %s430_s17 = scalar_lea.hbm %s783_s1, 256 }
  0x37   : > { %p431_p10 = scmp.lt.u32.totalorder %s681_s6, %s783_s1  ;;  %p432_p4 = scmp.lt.u32.totalorder %s430_s17, %s425_s9 }
  0x38   : > { %p428_p5 = pnand %p427_p3, %p426_p0  ;;  %p434_p2 = scmp.lt.u32.totalorder %s425_s9, %s681_s6 }
  0x39   : > { %p433_p1 = por %p432_p4, %p431_p10 }
  0x3a   : > { %p429_p7 = pneg %p428_p5 }
  0x3b   : > { %p435_p6 = por %p434_p2, %p433_p1 }
  0x3d   : > { %p436_p8 = pnand %p435_p6, %p429_p7 }
  0x3f   : > { %439 = shalt.err (!%p436_p8)
}
  0x40   : > { %s440_s26 = scalar_lea.vmem %s683_s7, 128  ;;  %s544_s29 = smov [#allocation4]  }
  0x41   : > { %p441_p9 = scmp.ne.s32.totalorder %s683_s7, %s440_s26  ;;  %s445_s4 = sshll.u32 %s544_s29, 4  ;;  %s446_s4 = int_to_ptr.vmem [resolvable:$false] %s445_s4 }
  0x42   : > { %s447_s5 = scalar_lea.vmem %s446_s4, 256  ;;  %p448_p5 = scmp.lt.s32.totalorder %s683_s7, %s446_s4 }
  0x43   : > { %p443_p12 = pnand %p441_p9, %p427_p3  ;;  %p449_p10 = scmp.lt.s32.totalorder %s447_s5, %s440_s26 }
  0x45   : > { %p444_p0 = pneg %p443_p12  ;;  %p450_p4 = por %p449_p10, %p448_p5 }
  0x47   : > { %p451_p1 = pnand %p450_p4, %p444_p0 }
  0x49   : > { %454 = shalt.err (!%p451_p1)
}
  0x4a   : > { %339 = dma.hbm_to_vmem [thread:$0]  (!%p685_p11), %s681_s6, 128, %s683_s7, %s147_s28  }
  0x4b   : > { %p801_p7 = scmp.ne.s32.totalorder %s794_s23, 0 }
  0x4c   : > { %s717_s20 = sand.u32 (!%p801_p7), 1, %s525_s13   ;;  %p802_p3 = scmp.ne.s32.totalorder (!%p801_p7), %s792_s21, 0 }
  0x4d   : > { %167 = sbr.rel (%p801_p7) target bundleno = 113 (0x71), region = 28  ;;  %s317_s9 = sshll.u32 (!%p801_p7), %s717_s20, 3 }
  0x4e   : > { %s170_s10 = scalar_lea.sflag (!%p801_p7), [#allocation5], %s717_s20  ;;  %s173_s11 = scalar_lea.vmem (!%p801_p7), [#allocation4], %s317_s9 }
  0x54   : > { %508 = dma.done.wait (%p802_p3), %s170_s10, 128  }
  0x55   : > { %510 = vsyncadd (%p802_p3), %s170_s10, 4294967168  ;;  %p803_p2 = scmp.ne.s32.totalorder %s790_s19, 0 }
  0x57   : > { %512 = dma.done.wait (%p803_p2), [#allocation8], 128  }
  0x58   : > { %514 = vsyncadd (%p803_p2), [#allocation8], 4294967168  ;;  %s197_s23 = scalar_lea.vmem [#allocation9], %s317_s9  ;;  %s321_s7 = sshll.u32 %s533_s0, 7  ;;  %v198_v0 = vld [vmem:[%s173_s11] sm:$0xff]  ;;  %v199_v1 = vld [vmem:[#allocation7] sm:$0xff] }
  0x59   : > { %s217_s6 = sshll.u32 %s197_s23, 4  ;;  %v200_v2 = vadd.f32 %v199_v1, %v198_v0  ;;  %s735_s28 = scalar_lea.hbm %s785_s3, %s321_s7  ;;  %s730_s6 = int_to_ptr.vmem [resolvable:$true] %s217_s6 }
  0x5a   : > { %s203_s19 = scalar_lea.sflag [#allocation6], %s717_s20  ;;  %s455_s17 = scalar_lea.vmem %s730_s6, 128 }
  0x5b   : > { %201 = vst [vmem:[%s197_s23] sm:$0xff] %v200_v2  ;;  %p456_p11 = scmp.ne.s32.totalorder %s730_s6, %s455_s17  ;;  %s545_s0 = smov [#allocation9]  }
  0x5c   : > { %s459_s18 = sshll.u32 %s545_s0, 4  ;;  %s460_s18 = int_to_ptr.vmem [resolvable:$false] %s459_s18 }
  0x5d   : > { %p457_p6 = pnand %p456_p11, %p667_p13  ;;  %s461_s25 = scalar_lea.vmem %s460_s18, 256 }
  0x5e   : > { %p462_p9 = scmp.lt.s32.totalorder %s730_s6, %s460_s18  ;;  %p463_p12 = scmp.lt.s32.totalorder %s461_s25, %s455_s17 }
  0x5f   : > { %p458_p8 = pneg %p457_p6 }
  0x60   : > { %p464_p0 = por %p463_p12, %p462_p9 }
  0x62   : > { %p465_p5 = pnand %p464_p0, %p458_p8 }
  0x64   : > { %468 = shalt.err (!%p465_p5)
}
  0x65   : > { %s469_s26 = scalar_lea.hbm %s735_s28, 128  ;;  %s473_s5 = scalar_lea.hbm %s785_s3, 256 }
  0x66   : > { %p470_p10 = scmp.ne.s32.totalorder %s735_s28, %s469_s26  ;;  %p474_p7 = scmp.lt.u32.totalorder %s735_s28, %s785_s3 }
  0x67   : > { %p475_p3 = scmp.lt.u32.totalorder %s473_s5, %s469_s26  ;;  %p477_p11 = scmp.lt.u32.totalorder %s469_s26, %s735_s28 }
  0x68   : > { %p471_p4 = pnand %p470_p10, %p667_p13 }
  0x69   : > { %p476_p2 = por %p475_p3, %p474_p7 }
  0x6a   : > { %p472_p1 = pneg %p471_p4 }
  0x6b   : > { %p478_p6 = por %p477_p11, %p476_p2 }
  0x6d   : > { %p479_p8 = pnand %p478_p6, %p472_p1 }
  0x6f   : > { %482 = shalt.err (!%p479_p8)
}
  0x70   : > { %330 = dma.vmem_to_hbm [thread:$0]  (%p667_p13), %s730_s6, 128, %s735_s28, %s203_s19  }
  0x71 PF: > { %s229_s10 = sand.u32 1, %s521_s12   ;;  %p804_p9 = scmp.ne.s32.totalorder %s793_s22, 0 }
  0x72   : > { %p805_p12 = scmp.ge.s32.totalorder %s541_s16, 2  ;;  %s230_s11 = scalar_lea.sflag [#allocation6], %s229_s10 }
  0x74   : > { %p341_p0 = pnand %p805_p12, %p804_p9 }
  0x76   : > { %516 = dma.done.wait (!%p341_p0), %s230_s11, 128  }
  0x77   : > { %518 = vsyncadd (!%p341_p0), %s230_s11, 4294967168  ;;  %s21_s16 = sadd.s32 1, %s541_s16   ;;  %s806_s12 = smov %s525_s13 }
  0x78   : > { %p18_p5 = scmp.ge.s32.totalorder %s21_s16, 4   ;;  %s807_s13 = smov %s529_s14 }
  0x79   : > { %s808_s14 = smov %s675_s30  ;;  %s809_s0 = smov %s537_s15 }
  0x7a   : > { %s810_s15 = smov %s812_s27  ;;  %20 = sbr.rel (!%p18_p5) target bundleno = 7 (0x7), region = 78 }
  0x81   :  { %235 = vsyncpa [#allocation5], 1 }
  0x82   :  { %237 = vsyncpa [#allocation5 + $0x1], 1 }
  0x83   :  { %238 = vsyncpa [#allocation8], 1 }
  0x84   :  { %239 = vsyncpa [#allocation6], 1 }
  0x85   :  { %241 = vsyncpa [#allocation6 + $0x1], 1 }

</bundles_post_ra>
